<compile_context>
chip_gen: v6e
topology: v6e:2x2x1
jax: 0.10.0
libtpu: 0.0.40
codegen_flags: <defaults>
</compile_context>

<pallas_src>
import functools

import jax
import jax.numpy as jnp
from jax.experimental import pallas as pl
from jax.experimental.pallas import tpu as pltpu


def _round_up(x, m):
    return (x + m - 1) // m * m


def _cdiv(a, b):
    return (a + b - 1) // b


def _discriminator_kernel(emb_ref, pos_ref, w1a_ref, w1b_ref, b1_ref,
                          w2_ref, b2_ref, out_ref):
    # ---- lin1 (concat fused as a split matmul) + ReLU, f32 accumulation ----
    h = (
        jnp.dot(emb_ref[...], w1a_ref[...], preferred_element_type=jnp.float32)
        + jnp.dot(pos_ref[...], w1b_ref[...], preferred_element_type=jnp.float32)
        + b1_ref[...]
    )
    h = jnp.maximum(h, 0.0)                       # (br, H) f32

    # ---- lin2 (H -> 1) + ReLU, computed lane-dense ----
    # (1, H) x (br, H)^T -> (1, br): native NT contraction (no vxpose of h);
    # per-row scalars land on the lane axis so the store is dense.
    o = jax.lax.dot_general(
        w2_ref[...], h,
        dimension_numbers=(((1,), (1,)), ((), ())),
        preferred_element_type=jnp.float32,
    )                                             # (1, br)
    o = jnp.maximum(o + b2_ref[0], 0.0)
    out_ref[0] = o.astype(out_ref.dtype)          # out_ref: (1, 1, br)


_SINGLE_BLOCK_N = 512   # below this, launch one block and skip pipelining


@functools.partial(jax.jit, static_argnames=("block_rows", "compute_dtype"))
def discriminator_forward(embeddings, positive, w1, b1, w2, b2, *,
                          block_rows=4096, compute_dtype=None):
    """Discriminator forward.

    embeddings, positive: (N, H)
    w1: (2H, H)   (already transposed from PyTorch's (H, 2H))
    b1: (H,)
    w2: (H, 1)    (already transposed from PyTorch's (1, H))
    b2: (1,)
    compute_dtype: dtype for activations / W1 on the MXU (accumulation is
        always f32).  bf16 is the recommended fast path on every generation
        (halves HBM traffic for this memory-bound kernel); None follows the
        input dtype.
    returns: (N, 1) float32
    """
    n, hidden = embeddings.shape
    assert positive.shape == (n, hidden)
    assert w1.shape == (2 * hidden, hidden)

    cdt = jnp.dtype(compute_dtype) if compute_dtype is not None else embeddings.dtype
    embeddings = embeddings.astype(cdt)
    positive = positive.astype(cdt)

    # Split W1: fuses torch.cat((e, p), -1) @ W1 == e @ W1[:H] + p @ W1[H:].
    w1a = w1[:hidden, :].astype(cdt)
    w1b = w1[hidden:, :].astype(cdt)
    b1_row = b1.reshape(1, hidden).astype(jnp.float32)
    w2_row = w2.reshape(1, hidden).astype(jnp.float32)
    b2_s = b2.reshape(1).astype(jnp.float32)

    # ---- Row tiling (no wrapper-side padding; cdiv grid overhangs last block) ----
    if n <= _SINGLE_BLOCK_N:
        # Tiny N (typical graph sizes): one block, nothing to pipeline.
        br = _round_up(max(n, 8), 8)
    else:
        # Big tiles for throughput, but keep >= 2 blocks so v7x megacore
        # (dimension_semantics="parallel") actually gets work on both TCs.
        br = min(int(block_rows), _round_up(_cdiv(n, 2), 8))
        br = max(8, _round_up(br, 8))
    num_blocks = _cdiv(n, br)

    # ---- VMEM budget (accounts for 128-lane padding of the H minor dim) ----
    lane = 128
    isz = jnp.dtype(cdt).itemsize
    hid_lanes = _round_up(hidden, lane)
    in_tile = br * hid_lanes * isz                       # one activation tile
    w_tile = _round_up(hidden, 8) * hid_lanes * isz      # one W1 half
    out_tile = 8 * _round_up(br, lane) * 4               # (1,1,br) f32, sublane pad
    vec_row = 8 * lane * 4                               # b1 / w2 rows, padded
    est = (2 * 2 * in_tile       # embeddings + positive, double-buffered
           + 2 * 2 * w_tile      # W1[:H] + W1[H:], double-buffered
           + 2 * out_tile        # output tile, double-buffered
           + 2 * 2 * vec_row     # b1, w2
           + (1 << 20))          # pipeline bookkeeping slack
    vmem_limit = int(min(max(int(est * 1.5), 4 << 20), 48 << 20))  # <=48MiB: v7x headroom

    out_slab = pl.pallas_call(
        _discriminator_kernel,
        out_shape=jax.ShapeDtypeStruct((num_blocks, 1, br), jnp.float32),
        grid_spec=pltpu.PrefetchScalarGridSpec(
            num_scalar_prefetch=0,
            grid=(num_blocks,),
            in_specs=[
                pl.BlockSpec((br, hidden), lambda i: (i, 0)),      # embeddings tile
                pl.BlockSpec((br, hidden), lambda i: (i, 0)),      # positive tile
                pl.BlockSpec((hidden, hidden), lambda i: (0, 0)),  # W1[:H] (resident)
                pl.BlockSpec((hidden, hidden), lambda i: (0, 0)),  # W1[H:] (resident)
                pl.BlockSpec((1, hidden), lambda i: (0, 0)),       # b1 row
                pl.BlockSpec((1, hidden), lambda i: (0, 0)),       # w2 row
                pl.BlockSpec(memory_space=pltpu.MemorySpace.SMEM), # b2 scalar
            ],
            out_specs=pl.BlockSpec((1, 1, br), lambda i: (i, 0, 0)),
        ),
        compiler_params=pltpu.CompilerParams(
            dimension_semantics=("parallel",),   # v7x: shard row tiles over 2 TCs
            vmem_limit_bytes=vmem_limit,
        ),
    )(embeddings, positive, w1a, w1b, b1_row, w2_row, b2_s)

    # (num_blocks, 1, br) lane-dense slab -> (N, 1); overhang rows sliced off.
    return out_slab.reshape(num_blocks * br)[:n].reshape(n, 1)


def _init_linear(key, in_features, out_features):
    """Deterministic init mimicking torch.nn.Linear.reset_parameters
    (uniform(-1/sqrt(in), 1/sqrt(in)) for weight and bias).
    Weight returned already transposed to (in_features, out_features)."""
    kw, kb = jax.random.split(key)
    bound = 1.0 / jnp.sqrt(jnp.float32(in_features))
    w = jax.random.uniform(kw, (in_features, out_features), jnp.float32,
                           minval=-bound, maxval=bound)
    b = jax.random.uniform(kb, (out_features,), jnp.float32,
                           minval=-bound, maxval=bound)
    return w, b


def _reference_forward(embeddings, positive, w1, b1, w2, b2):
    x = jnp.concatenate([embeddings, positive], axis=-1)
    pre = jnp.maximum(x @ w1 + b1, 0.0)
    pre = jnp.maximum(pre @ w2 + b2, 0.0)
    return pre


if __name__ == "__main__":
    hidden = 32   # hidden_size of the Discriminator
    key = jax.random.PRNGKey(0)
    k_e, k_p, k_l1, k_l2, k_e2, k_p2 = jax.random.split(key, 6)

    w1, b1 = _init_linear(k_l1, 2 * hidden, hidden)  # lin1: 2H -> H
    w2, b2 = _init_linear(k_l2, hidden, 1)           # lin2: H -> 1

    # --- small demo shape (typical graph-node counts): single-block fast path ---
    n_small = 8
    emb_s = jax.random.normal(k_e, (n_small, hidden), jnp.float32)
    pos_s = jax.random.normal(k_p, (n_small, hidden), jnp.float32)
    out_s = jax.block_until_ready(discriminator_forward(emb_s, pos_s, w1, b1, w2, b2))
    ref_s = _reference_forward(emb_s, pos_s, w1, b1, w2, b2)
    assert out_s.shape == (n_small, 1)
    assert jnp.allclose(out_s, ref_s, atol=1e-4, rtol=1e-4), "f32 small mismatch"

    # --- larger, non-multiple row count: multi-block grid + overhanging last
    #     block (no wrapper padding) + lane-dense multi-block output path ---
    n_big = 1000
    emb_b = jax.random.normal(k_e2, (n_big, hidden), jnp.float32)
    pos_b = jax.random.normal(k_p2, (n_big, hidden), jnp.float32)
    out_b = jax.block_until_ready(
        discriminator_forward(emb_b, pos_b, w1, b1, w2, b2, block_rows=256))
    ref_b = _reference_forward(emb_b, pos_b, w1, b1, w2, b2)
    assert out_b.shape == (n_big, 1)
    assert jnp.allclose(out_b, ref_b, atol=1e-4, rtol=1e-4), "f32 large mismatch"

    # --- bf16 activations / W1 with f32 MXU accumulation (recommended on all
    #     generations for this memory-bound kernel, incl. v5e) ---
    out_bf = jax.block_until_ready(
        discriminator_forward(emb_b, pos_b, w1, b1, w2, b2,
                              block_rows=256, compute_dtype=jnp.bfloat16))
    ref_bf = _reference_forward(
        emb_b.astype(jnp.bfloat16).astype(jnp.float32),
        pos_b.astype(jnp.bfloat16).astype(jnp.float32),
        w1.astype(jnp.bfloat16).astype(jnp.float32), b1, w2, b2)
    assert out_bf.shape == (n_big, 1)
    assert jnp.allclose(out_bf, ref_bf, atol=1e-3, rtol=1e-3), "bf16 mismatch"

    print("KERNEL_OK")
</pallas_src>

<mosaic_0001>
module attributes {stable_mosaic.version = 11 : i64} {
  func.func @_discriminator_kernel(%arg0: i32, %arg1: memref<8x32xf32, #tpu.memory_space<vmem>>, %arg2: memref<8x32xf32, #tpu.memory_space<vmem>>, %arg3: memref<32x32xf32, #tpu.memory_space<vmem>>, %arg4: memref<32x32xf32, #tpu.memory_space<vmem>>, %arg5: memref<1x32xf32, #tpu.memory_space<vmem>>, %arg6: memref<1x32xf32, #tpu.memory_space<vmem>>, %arg7: memref<1xf32, #tpu.memory_space<smem>>, %arg8: memref<1x1x8xf32, #tpu.memory_space<vmem>>) attributes {dimension_semantics = [#tpu.dimension_semantics<parallel>], iteration_bounds = array<i64: 1>, scalar_prefetch = 0 : i64, scratch_operands = 0 : i64, tpu.core_type = #tpu.core_type<tc>, window_params = [{transform_indices = @transform_0, window_bounds = array<i64: 8, 32>}, {transform_indices = @transform_1, window_bounds = array<i64: 8, 32>}, {pipeline_mode = #tpu.pipeline_mode<synchronous>, transform_indices = @transform_2, window_bounds = array<i64: 32, 32>}, {pipeline_mode = #tpu.pipeline_mode<synchronous>, transform_indices = @transform_3, window_bounds = array<i64: 32, 32>}, {pipeline_mode = #tpu.pipeline_mode<synchronous>, transform_indices = @transform_4, window_bounds = array<i64: 1, 32>}, {pipeline_mode = #tpu.pipeline_mode<synchronous>, transform_indices = @transform_5, window_bounds = array<i64: 1, 32>}, {transform_indices = @transform_6, window_bounds = array<i64: 1>}, {transform_indices = @transform_7, window_bounds = array<i64: 1, 1, 8>}]} {
    %c0 = arith.constant 0 : index
    %c0_0 = arith.constant 0 : index
    %0 = vector.load %arg1[%c0, %c0_0] : memref<8x32xf32, #tpu.memory_space<vmem>>, vector<8x32xf32>
    %c0_1 = arith.constant 0 : index
    %c0_2 = arith.constant 0 : index
    %1 = vector.load %arg3[%c0_1, %c0_2] : memref<32x32xf32, #tpu.memory_space<vmem>>, vector<32x32xf32>
    %cst = arith.constant dense<0.000000e+00> : vector<8x32xf32>
    %2 = tpu.matmul %0, %1, %cst {dimension_numbers = #tpu.dot_dimension_numbers<[1], [0], [0], [1], [0, 0, 1, 1], [], []>} : vector<8x32xf32>, vector<32x32xf32>, vector<8x32xf32> -> vector<8x32xf32>
    %c0_3 = arith.constant 0 : index
    %c0_4 = arith.constant 0 : index
    %3 = vector.load %arg2[%c0_3, %c0_4] : memref<8x32xf32, #tpu.memory_space<vmem>>, vector<8x32xf32>
    %c0_5 = arith.constant 0 : index
    %c0_6 = arith.constant 0 : index
    %4 = vector.load %arg4[%c0_5, %c0_6] : memref<32x32xf32, #tpu.memory_space<vmem>>, vector<32x32xf32>
    %cst_7 = arith.constant dense<0.000000e+00> : vector<8x32xf32>
    %5 = tpu.matmul %3, %4, %cst_7 {dimension_numbers = #tpu.dot_dimension_numbers<[1], [0], [0], [1], [0, 0, 1, 1], [], []>} : vector<8x32xf32>, vector<32x32xf32>, vector<8x32xf32> -> vector<8x32xf32>
    %6 = arith.addf %2, %5 : vector<8x32xf32>
    %c0_8 = arith.constant 0 : index
    %c0_9 = arith.constant 0 : index
    %7 = vector.load %arg5[%c0_8, %c0_9] : memref<1x32xf32, #tpu.memory_space<vmem>>, vector<1x32xf32>
    %8 = vector.broadcast %7 : vector<1x32xf32> to vector<8x32xf32>
    %9 = arith.addf %6, %8 : vector<8x32xf32>
    %cst_10 = arith.constant 0.000000e+00 : f32
    %10 = vector.broadcast %cst_10 : f32 to vector<8x32xf32>
    %11 = arith.maximumf %9, %10 : vector<8x32xf32>
    %c0_11 = arith.constant 0 : index
    %c0_12 = arith.constant 0 : index
    %12 = vector.load %arg6[%c0_11, %c0_12] : memref<1x32xf32, #tpu.memory_space<vmem>>, vector<1x32xf32>
    %cst_13 = arith.constant dense<0.000000e+00> : vector<1x8xf32>
    %13 = tpu.matmul %12, %11, %cst_13 {dimension_numbers = #tpu.dot_dimension_numbers<[1], [1], [0], [0], [0, 0, 1, 0], [], []>} : vector<1x32xf32>, vector<8x32xf32>, vector<1x8xf32> -> vector<1x8xf32>
    %c0_14 = arith.constant 0 : index
    %14 = memref.load %arg7[%c0_14] : memref<1xf32, #tpu.memory_space<smem>>
    %15 = vector.broadcast %14 : f32 to vector<1x8xf32>
    %16 = arith.addf %13, %15 : vector<1x8xf32>
    %cst_15 = arith.constant 0.000000e+00 : f32
    %17 = vector.broadcast %cst_15 : f32 to vector<1x8xf32>
    %18 = arith.maximumf %16, %17 : vector<1x8xf32>
    %c0_16 = arith.constant 0 : index
    %c0_17 = arith.constant 0 : index
    %c0_18 = arith.constant 0 : index
    %19 = vector.load %arg8[%c0_16, %c0_17, %c0_18] : memref<1x1x8xf32, #tpu.memory_space<vmem>>, vector<1x1x8xf32>
    %20 = vector.shape_cast %19 : vector<1x1x8xf32> to vector<1x8xf32>
    %21 = vector.shape_cast %18 : vector<1x8xf32> to vector<1x1x8xf32>
    tpu.vector_store %arg8[%c0_16, %c0_17, %c0_18], %21 {strides = array<i32>} : memref<1x1x8xf32, #tpu.memory_space<vmem>>, vector<1x1x8xf32>,
    return
  }
  func.func @transform_0(%arg0: i32) -> (i32, i32) {
    %c0_i32 = arith.constant 0 : i32
    %c0_i32_0 = arith.constant 0 : i32
    return %arg0, %c0_i32 : i32, i32
  }
  func.func @transform_1(%arg0: i32) -> (i32, i32) {
    %c0_i32 = arith.constant 0 : i32
    %c0_i32_0 = arith.constant 0 : i32
    return %arg0, %c0_i32 : i32, i32
  }
  func.func @transform_2(%arg0: i32) -> (i32, i32) {
    %c0_i32 = arith.constant 0 : i32
    %c0_i32_0 = arith.constant 0 : i32
    %c0_i32_1 = arith.constant 0 : i32
    return %c0_i32, %c0_i32_0 : i32, i32
  }
  func.func @transform_3(%arg0: i32) -> (i32, i32) {
    %c0_i32 = arith.constant 0 : i32
    %c0_i32_0 = arith.constant 0 : i32
    %c0_i32_1 = arith.constant 0 : i32
    return %c0_i32, %c0_i32_0 : i32, i32
  }
  func.func @transform_4(%arg0: i32) -> (i32, i32) {
    %c0_i32 = arith.constant 0 : i32
    %c0_i32_0 = arith.constant 0 : i32
    %c0_i32_1 = arith.constant 0 : i32
    return %c0_i32, %c0_i32_0 : i32, i32
  }
  func.func @transform_5(%arg0: i32) -> (i32, i32) {
    %c0_i32 = arith.constant 0 : i32
    %c0_i32_0 = arith.constant 0 : i32
    %c0_i32_1 = arith.constant 0 : i32
    return %c0_i32, %c0_i32_0 : i32, i32
  }
  func.func @transform_6(%arg0: i32) -> i32 {
    %c0_i32 = arith.constant 0 : i32
    %c0_i32_0 = arith.constant 0 : i32
    return %c0_i32 : i32
  }
  func.func @transform_7(%arg0: i32) -> (i32, i32, i32) {
    %c0_i32 = arith.constant 0 : i32
    %c0_i32_0 = arith.constant 0 : i32
    %c0_i32_1 = arith.constant 0 : i32
    return %arg0, %c0_i32, %c0_i32_0 : i32, i32, i32
  }
}

</mosaic_0001>

<bundles_post_ra>
// kernel: discriminator_forward.1
= control target key start
LH: loop header
LB: loop body
LE: loop exit
PB: predicated region body
PF: predicated region fallthrough
CT: control target
= control target key end

     0   :  { %v359_v2 = vmov 0.0   ;;  %s448_s0 = inlined_call_operand.vmem [shape: f32[8,32], index: 0, kind: input, shape index: {}]   ;;  %s449_s1 = inlined_call_operand.vmem [shape: f32[8,32], index: 1, kind: input, shape index: {}]   ;;  %s450_s2 = inlined_call_operand.vmem [shape: f32[32,32], index: 2, kind: input, shape index: {}]   ;;  %s451_s3 = inlined_call_operand.vmem [shape: f32[32,32], index: 3, kind: input, shape index: {}]   ;;  %s452_s4 = inlined_call_operand.vmem [shape: f32[1,32], index: 4, kind: input, shape index: {}]   ;;  %s453_s5 = inlined_call_operand.vmem [shape: f32[1,32], index: 5, kind: input, shape index: {}]   ;;  %s454_s6 = inlined_call_operand.<no memory space> [shape: f32[1], index: 6, kind: input, shape index: {}]   ;;  %s455_s7 = inlined_call_operand.hbm [shape: f32[1,1,8], index: 7, kind: output, shape index: {}]  }
   0x1   :  { %v37_v0 = vld [vmem:[%s451_s3 + $0x18] sm:$0xff]  ;;  %307 = vmatprep.subr.mxu0 %v359_v2  ;;  %318 = vmatprep.subr.mxu1 %v359_v2  ;;  %v36_v3 = vld [vmem:[%s451_s3 + $0x10] sm:$0xff]  ;;  %v35_v5 = vld [vmem:[%s451_s3 + $0x8] sm:$0xff] }
   0x2   :  { %v32_v1 = vld [vmem:[%s450_s2 + $0x18] sm:$0xff]  ;;  %v31_v4 = vld [vmem:[%s450_s2 + $0x10] sm:$0xff]  ;;  %308 = vmatpush3.msra.mxu0 %v37_v0  ;;  %v30_v6 = vld [vmem:[%s450_s2 + $0x8] sm:$0xff] }
   0x3   :  { %319 = vmatpush3.msra.mxu1 %v32_v1  ;;  %309 = vmatprep.subr.mxu0 %v359_v2 }
   0x4   :  { %320 = vmatprep.subr.mxu1 %v359_v2 }
   0x5   :  { %13 = vsyncpa [#allocation4], 0  ;;  %310 = vmatpush3.msra.mxu0 %v36_v3  ;;  %321 = vmatpush3.msra.mxu1 %v31_v4  ;;  %v34_v7 = vld [vmem:[%s451_s3] sm:$0xff]  ;;  %vm38_vm0 = vcmask 261120   ;;  %vm360_vm1 = vmmov 0   ;;  %v196_v20 = vstv %s454_s6  ;;  %s361_s23 = smov [#allocation3]  }
   0x6   :  { %311 = vmatprep.subr.mxu0 %v359_v2  ;;  %322 = vmatprep.subr.mxu1 %v359_v2  ;;  %v29_v8 = vld [vmem:[%s450_s2] sm:$0xff]  ;;  %vm274_vm2 = vcmask 57344  }
   0x7   :  { %312 = vmatpush3.msra.mxu0 %v35_v5  ;;  %323 = vmatpush3.msra.mxu1 %v30_v6  ;;  %v33_v9 = vld [vmem:[%s449_s1] sm:$0xff] }
   0x8   :  { %313 = vmatprep.subr.mxu0 %v359_v2  ;;  %324 = vmatprep.subr.mxu1 %v359_v2  ;;  %v28_v10 = vld [vmem:[%s448_s0] sm:$0xff] }
   0x9   :  { %314 = vmatpush3.msra.mxu0 %v34_v7  ;;  %315 = vmatprep.mubr.msk.f32.mxu0 %vm360_vm1, %v359_v2  ;;  %v292_v13 = vld [vmem:[%s452_s4] ss:$0 sm:$0xff]  ;;  %s282_s4 = sshll.u32 %s361_s23, 4  ;;  %s283_s4 = int_to_ptr.vmem [resolvable:$true] %s282_s4 }
   0xa   :  { %325 = vmatpush3.msra.mxu1 %v29_v8  ;;  %326 = vmatprep.mubr.msk.f32.mxu1 %vm360_vm1, %v359_v2  ;;  %v194_v19 = vld [vmem:[%s453_s5] sm:$0x1]  ;;  %s337_s24 = scalar_lea.vmem %s283_s4, 16  ;;  %s341_s25 = scalar_lea.vmem %s283_s4, 32 }
   0xb   :  { %316 = vmatmul.mubr.msk.f32.vlgmr.msra.gmra.mxu0 %vm38_vm0, %v33_v9  ;;  %327 = vmatmul.mubr.msk.f32.vlgmr.msra.gmra.mxu1 %vm38_vm0, %v28_v10  ;;  %p338_p0 = scmp.ne.s32.totalorder %s283_s4, %s337_s24  ;;  %p342_p1 = scmp.lt.s32.totalorder %s283_s4, %s283_s4 }
   0xc   :  { %329 = vmatprep.subr.mxu0 %v359_v2  ;;  %331 = vmatprep.mubr.msk.f32.mxu0 %vm360_vm1, %v359_v2  ;;  %p343_p2 = scmp.lt.s32.totalorder %s341_s25, %s337_s24 }
   0xe   :  { %p344_p3 = por %p343_p2, %p342_p1 }
  0x10   :  { %p345_p4 = pnand %p344_p3, %p338_p0 }
  0xcb   :  { %v108_v11 = vpop.f32.mrf.mxu0  ;;  %v181_v12 = vpop.f32.mrf.mxu1 }
  0xcc   :  { %v182_v14 = vadd.f32 %v181_v12, %v108_v11 }
  0xcd   :  { %v317_v15 = vpop.f32.mrf.mxu0  ;;  %v328_v16 = vpop.f32.mrf.mxu1 }
  0xce   :  { %v192_v17 = vadd.f32 %v292_v13, %v182_v14 }
  0xd0   :  { %v193_v18 = vmax.f32 %v192_v17, 0.0 }
  0xd2   :  { %330 = vmatpush3.xpose.msk.msra.mxu0 %vm38_vm0, %v193_v18 }
  0xd5   :  { %332 = vmatmul.mubr.msk.f32.vlgmr.msra.gmra.mxu0 %vm38_vm0, %v194_v19 }
 0x195   :  { %v269_v21 = vpop.f32.mrf.mxu0 }
 0x196   :  { %v270_v22 = vadd.f32 %v269_v21, %v196_v20 }
 0x197   :  { %v333_v23 = vpop.f32.mrf.mxu0 }
 0x198   :  { %v273_v24 = vmax.f32 %v270_v22, 0.0 }
 0x19a   :  { %275 = vst.msk [vmem:[#allocation3] sm:$0x1] %vm274_vm2, %v273_v24 }
 0x19b   :  { %348 = shalt.err (!%p345_p4)
}
 0x19c   :  { %285 = dma.vmem_to_hbm [thread:$0]  %s283_s4, 16, %s455_s7, [#allocation4]  }
 0x19d   :  { %357 = dma.done.wait [#allocation4], 16  }
 0x19e   :  { %358 = vsyncadd [#allocation4], 4294967280 }
 0x19f   :  { %289 = vsyncpa [#allocation4], 1 }

</bundles_post_ra>
